<compile_context>
chip_gen: v7x
topology: tpu7x:2x2x1
jax: 0.10.0
libtpu: 0.0.40
codegen_flags: <defaults>
</compile_context>

<pallas_src>
import functools

import jax
import jax.numpy as jnp
from jax import lax
from jax.experimental import pallas as pl
from jax.experimental.pallas import tpu as pltpu

_LANES = 128
_DEFAULT_BLOCK_BYTES = 4 * 1024 * 1024   # per-input, per-buffer VMEM budget
_CHUNK_ELEMS = 512 * 128                 # target elements per in-kernel chunk
_SMALL_N = 1 << 17                       # below this, fused XLA wins


def _round_up(x, m):
    return -(-x // m) * m


def _kld_loss_xla(mu, logvar):
    """Fused pure-XLA path (also serves as the reference)."""
    mu32 = mu.astype(jnp.float32)
    lv32 = logvar.astype(jnp.float32)
    per_sample = -0.5 * jnp.sum(1.0 + lv32 - mu32 * mu32 - jnp.exp(lv32), axis=1)
    return jnp.mean(per_sample)


def _kld_partial_kernel(mu_ref, lv_ref, out_ref, *, tile_r, chunk, valid_rows,
                        mask_rows):
    """Per-block partial sums of (1 + logvar - mu^2 - exp(logvar)).

    Block shapes: mu/lv (tile_r, W); out (1, W).  Reduction runs chunked over
    the sublane (row) axis only, so the store stays lane-dense and the f32
    temporaries never exceed ~chunk*W elements.
    """
    i = pl.program_id(0)
    width = out_ref.shape[-1]
    nchunks = tile_r // chunk

    if mask_rows:
        # Hoisted once (not re-materialized per chunk).
        row_iota = lax.broadcasted_iota(jnp.int32, (chunk, width), 0)

    def body(c, acc):
        start = pl.multiple_of(c * chunk, chunk)
        mu = mu_ref[pl.ds(start, chunk), :].astype(jnp.float32)
        lv = lv_ref[pl.ds(start, chunk), :].astype(jnp.float32)
        term = 1.0 + lv - mu * mu - jnp.exp(lv)   # VPU + EUP, hidden under DMA
        if mask_rows:
            row = i * tile_r + start + row_iota
            term = jnp.where(row < valid_rows, term, 0.0)
        return acc + jnp.sum(term, axis=0, keepdims=True)

    acc0 = jnp.zeros((1, width), jnp.float32)
    out_ref[...] = lax.fori_loop(0, nchunks, body, acc0)


def kld_loss(mu, logvar, *, use_kernel=None, block_bytes=_DEFAULT_BLOCK_BYTES):
    """KL divergence loss matching the PyTorch KLDLoss module.

    Pass mu/logvar in their native dtype (bf16 stays bf16 on the wire; the
    f32 upcast happens inside the kernel).
    """
    assert mu.shape == logvar.shape and mu.ndim == 2, (mu.shape, logvar.shape)
    B, D = mu.shape
    n = B * D

    if use_kernel is None:
        use_kernel = n >= _SMALL_N
    if not use_kernel or n == 0:
        return _kld_loss_xla(mu, logvar)

    # Layout: lane-dense (rows, 128) when a free reshape is possible (no pad,
    # no copy); otherwise stream the natural (B, D) layout directly.
    if n % _LANES == 0:
        rows, width = n // _LANES, _LANES
        mu2 = mu.reshape(rows, width)
        lv2 = logvar.reshape(rows, width)
    else:
        rows, width = B, D
        mu2, lv2 = mu, logvar

    lanes = _round_up(width, _LANES)   # VMEM lane footprint of one row
    itemsize = max(jnp.dtype(mu.dtype).itemsize, jnp.dtype(logvar.dtype).itemsize)

    # In-kernel chunk: ~64K elements, a multiple of 8 rows, capped by the data.
    chunk = max(8, min(512,
                       ((_CHUNK_ELEMS // lanes) // 8) * 8,
                       _round_up(rows, 8)))

    # Block rows: ~block_bytes of VMEM per input per buffer (amortizes the
    # ~0.35 us per-step cost; 2 inputs x 2 buffers stays well under 32 MiB
    # scoped VMEM on v5e/v6e/v7x), capped at ~ceil(rows/4) so the "parallel"
    # grid keeps >= 4 blocks for v7x's two TensorCores when the input allows.
    budget_rows = max(chunk, ((block_bytes // (lanes * itemsize)) // chunk) * chunk)
    split_rows = _round_up(max(1, -(-rows // 4)), chunk)
    tile_r = max(chunk, min(budget_rows, split_rows))
    num_blocks = -(-rows // tile_r)
    mask_rows = (rows % tile_r) != 0

    kernel = functools.partial(
        _kld_partial_kernel,
        tile_r=tile_r, chunk=chunk, valid_rows=rows, mask_rows=mask_rows)

    in_bytes = jnp.dtype(mu.dtype).itemsize + jnp.dtype(logvar.dtype).itemsize
    cost = pl.CostEstimate(
        flops=5 * n,
        transcendentals=n,
        bytes_accessed=n * in_bytes + num_blocks * width * 4,
    )

    partial = pl.pallas_call(
        kernel,
        out_shape=jax.ShapeDtypeStruct((num_blocks, width), jnp.float32),
        grid=(num_blocks,),
        in_specs=[
            pl.BlockSpec((tile_r, width), lambda i: (i, 0)),
            pl.BlockSpec((tile_r, width), lambda i: (i, 0)),
        ],
        out_specs=pl.BlockSpec((1, width), lambda i: (i, 0)),
        compiler_params=pltpu.CompilerParams(
            dimension_semantics=("parallel",),
            vmem_limit_bytes=32 * 1024 * 1024,
        ),
        cost_estimate=cost,
    )(mu2, lv2)

    # Tiny final reduce + single normalization by the TRUE batch size
    # (masked/garbage rows contributed exactly 0 to the partials).
    return (-0.5 / B) * jnp.sum(partial)


if __name__ == "__main__":
    key = jax.random.PRNGKey(0)
    ks = jax.random.split(key, 6)

    # 1) Tiny VAE-latent case consistent with the module (batch=2, latent=32):
    #    auto-dispatches to the fused XLA fast path.
    B, D = 2, 32
    mu = jax.random.normal(ks[0], (B, D), dtype=jnp.float32)
    lv = jax.random.normal(ks[1], (B, D), dtype=jnp.float32) * 0.1
    out = kld_loss(mu, lv)
    jax.block_until_ready(out)
    ref = _kld_loss_xla(mu, lv)
    assert jnp.allclose(out, ref, rtol=1e-5, atol=1e-5), (out, ref)

    # 1b) Same tiny case forced through the Pallas kernel
    #     (natural (B, D) layout, single edge block, row masking).
    out_k = kld_loss(mu, lv, use_kernel=True)
    jax.block_until_ready(out_k)
    assert jnp.allclose(out_k, ref, rtol=1e-5, atol=1e-5), (out_k, ref)

    # 2) Larger aligned f32 case: lane-dense reshape path, multi-block
    #    "parallel" grid (num_blocks=4), no masking.
    B2, D2 = 4096, 64
    mu2 = jax.random.normal(ks[2], (B2, D2), dtype=jnp.float32)
    lv2 = jax.random.normal(ks[3], (B2, D2), dtype=jnp.float32) * 0.1
    out2 = kld_loss(mu2, lv2)
    jax.block_until_ready(out2)
    ref2 = _kld_loss_xla(mu2, lv2)
    assert jnp.allclose(out2, ref2, rtol=1e-4, atol=1e-3), (out2, ref2)

    # 3) Unaligned bf16 case: natural (B, D) layout (D not 128-divisible),
    #    edge-block row masking, bf16 kept on the HBM wire.
    B3, D3 = 1031, 144
    mu3 = jax.random.normal(ks[4], (B3, D3), dtype=jnp.bfloat16)
    lv3 = (jax.random.normal(ks[5], (B3, D3), dtype=jnp.float32) * 0.1).astype(jnp.bfloat16)
    out3 = kld_loss(mu3, lv3, use_kernel=True)
    jax.block_until_ready(out3)
    ref3 = _kld_loss_xla(mu3, lv3)
    assert jnp.allclose(out3, ref3, rtol=5e-3, atol=5e-3), (out3, ref3)

    print("KERNEL_OK")
</pallas_src>

<mosaic_0001>
module attributes {stable_mosaic.version = 11 : i64} {
  func.func @_kld_partial_kernel(%arg0: i32, %arg1: memref<8x32xf32, #tpu.memory_space<vmem>>, %arg2: memref<8x32xf32, #tpu.memory_space<vmem>>, %arg3: memref<1x32xf32, #tpu.memory_space<vmem>>) attributes {dimension_semantics = [#tpu.dimension_semantics<parallel>], iteration_bounds = array<i64: 1>, scalar_prefetch = 0 : i64, scratch_operands = 0 : i64, tpu.core_type = #tpu.core_type<tc>, window_params = [{transform_indices = @transform_0, window_bounds = array<i64: 8, 32>}, {transform_indices = @transform_1, window_bounds = array<i64: 8, 32>}, {transform_indices = @transform_2, window_bounds = array<i64: 1, 32>}]} {
    %0 = tpu.iota {dimensions = array<i32: 0>} : vector<8x32xi32>
    %cst = arith.constant 0.000000e+00 : f32
    %1 = vector.broadcast %cst : f32 to vector<1x32xf32>
    %c0_i32 = arith.constant 0 : i32
    %c8_i32 = arith.constant 8 : i32
    %2 = arith.muli %c0_i32, %c8_i32 : i32
    %3 = tpu.assume_multiple %2, 8 : i32
    %4 = arith.index_cast %3 : i32 to index
    %c0 = arith.constant 0 : index
    %5 = vector.load %arg1[%4, %c0] : memref<8x32xf32, #tpu.memory_space<vmem>>, vector<8x32xf32>
    %6 = arith.index_cast %3 : i32 to index
    %c0_0 = arith.constant 0 : index
    %7 = vector.load %arg2[%6, %c0_0] : memref<8x32xf32, #tpu.memory_space<vmem>>, vector<8x32xf32>
    %cst_1 = arith.constant 1.000000e+00 : f32
    %8 = vector.broadcast %cst_1 : f32 to vector<8x32xf32>
    %9 = arith.addf %8, %7 : vector<8x32xf32>
    %10 = arith.mulf %5, %5 : vector<8x32xf32>
    %11 = arith.subf %9, %10 : vector<8x32xf32>
    %12 = math.exp %7 : vector<8x32xf32>
    %13 = arith.subf %11, %12 : vector<8x32xf32>
    %c8_i32_2 = arith.constant 8 : i32
    %14 = arith.muli %arg0, %c8_i32_2 : i32
    %15 = arith.addi %14, %3 : i32
    %16 = vector.broadcast %15 : i32 to vector<8x32xi32>
    %17 = arith.addi %16, %0 : vector<8x32xi32>
    %c2_i32 = arith.constant 2 : i32
    %18 = vector.broadcast %c2_i32 : i32 to vector<8x32xi32>
    %19 = arith.cmpi slt, %17, %18 : vector<8x32xi32>
    %cst_3 = arith.constant 0.000000e+00 : f32
    %20 = vector.broadcast %cst_3 : f32 to vector<8x32xf32>
    %21 = arith.select %19, %13, %20 : vector<8x32xi1>, vector<8x32xf32>
    %cst_4 = arith.constant dense<0.000000e+00> : vector<32xf32>
    %22 = vector.multi_reduction <add>, %21, %cst_4 [0] : vector<8x32xf32> to vector<32xf32>
    %23 = vector.shape_cast %22 : vector<32xf32> to vector<1x32xf32>
    %24 = arith.addf %1, %23 : vector<1x32xf32>
    %c1_i32 = arith.constant 1 : i32
    %c0_5 = arith.constant 0 : index
    %c0_6 = arith.constant 0 : index
    %25 = vector.load %arg3[%c0_5, %c0_6] : memref<1x32xf32, #tpu.memory_space<vmem>>, vector<1x32xf32>
    tpu.vector_store %arg3[%c0_5, %c0_6], %24 {strides = array<i32>} : memref<1x32xf32, #tpu.memory_space<vmem>>, vector<1x32xf32>,
    return
  }
  func.func @transform_0(%arg0: i32) -> (i32, i32) {
    %c0_i32 = arith.constant 0 : i32
    %c0_i32_0 = arith.constant 0 : i32
    return %arg0, %c0_i32 : i32, i32
  }
  func.func @transform_1(%arg0: i32) -> (i32, i32) {
    %c0_i32 = arith.constant 0 : i32
    %c0_i32_0 = arith.constant 0 : i32
    return %arg0, %c0_i32 : i32, i32
  }
  func.func @transform_2(%arg0: i32) -> (i32, i32) {
    %c0_i32 = arith.constant 0 : i32
    %c0_i32_0 = arith.constant 0 : i32
    return %arg0, %c0_i32 : i32, i32
  }
}

</mosaic_0001>

<bundles_post_ra>
// kernel: tpu_custom_call.1
= control target key start
LH: loop header
LB: loop body
LE: loop exit
PB: predicated region body
PF: predicated region fallthrough
CT: control target
= control target key end

     0   :  { %7 = vsyncpa [#allocation3], 0  ;;  %s168_s0 = inlined_call_operand.hbm [shape: f32[2,32], index: 0, kind: input, shape index: {}]   ;;  %s169_s1 = inlined_call_operand.vmem [shape: f32[2,32], index: 1, kind: input, shape index: {}]   ;;  %s170_s2 = inlined_call_operand.hbm [shape: f32[1,32], index: 2, kind: output, shape index: {}]  }
   0x1   :  { %8 = vsyncpa [#allocation4], 0 }
   0x2   :  { %13 = vsyncadd [#allocation3], 96  ;;  %s122_s9 = smov [#allocation2]   ;;  %s74_s13 = scalar_lea.hbm %s168_s0, 32 }
   0x3   :  { %s14_s10 = sshll.u32 %s122_s9, 4  ;;  %p75_p0 = scmp.ne.s32.totalorder %s168_s0, %s74_s13  ;;  %s15_s10 = int_to_ptr.vmem [resolvable:$true] %s14_s10 }
   0x4   :  { %p78_p1 = scmp.lt.u32.totalorder %s74_s13, %s168_s0 }
   0x6   :  { %p80_p2 = pnand %p78_p1, %p75_p0 }
   0x8   :  { %83 = shalt.err (!%p80_p2)
}
   0x9   :  { %s84_s18 = scalar_lea.vmem %s15_s10, 32  ;;  %s88_s19 = scalar_lea.vmem %s15_s10, 128 }
   0xa   :  { %p85_p3 = scmp.ne.s32.totalorder %s15_s10, %s84_s18  ;;  %p89_p4 = scmp.lt.s32.totalorder %s15_s10, %s15_s10 }
   0xb   :  { %p90_p5 = scmp.lt.s32.totalorder %s88_s19, %s84_s18 }
   0xd   :  { %p91_p6 = por %p90_p5, %p89_p4 }
   0xf   :  { %p92_p7 = pnand %p91_p6, %p85_p3 }
  0x11   :  { %95 = shalt.err (!%p92_p7)
}
  0x12   :  { %s123_s20 = smov 32   ;;  %s124_s21 = smov 2  }
  0x13   :  { %20 = dma.hbm_to_vmem [thread:$0]  %s168_s0, 32, %s15_s10, [#allocation3], %s123_s20, %s123_s20, %s124_s21  }
  0x14   :  { %118 = dma.done.wait [#allocation3], 128  }
  0x15   :  { %119 = vsyncadd [#allocation3], 4294967168  ;;  %v29_v0 = vld [vmem:[%s169_s1] sm:$0xff]  ;;  %v26_v3 = vlaneseq  ;;  %vm42_vm1 = vcmask 261120   ;;  %s125_s0 = smov [#allocation5]   ;;  %vm51_vm2 = vcmask 253952  }
  0x16   :  { %v33_v1 = vmul.f32 1.442695, %v29_v0  ;;  %v28_v2 = vld [vmem:[#allocation2] sm:$0xff]  ;;  %v30_v4 = vadd.f32 1.0, %v29_v0  ;;  %s59_s1 = sshll.u32 %s125_s0, 4  ;;  %s60_s1 = int_to_ptr.vmem [resolvable:$true] %s59_s1 }
  0x17   :  { %v31_v5 = vmul.f32 %v28_v2, %v28_v2  ;;  %v27_v6 = vshrl.u32 %v26_v3, 7  ;;  %s96_s26 = scalar_lea.vmem %s60_s1, 16  ;;  %s100_s27 = scalar_lea.vmem %s60_s1, 32 }
  0x18   :  { %72 = vpow2.f32 %v33_v1  ;;  %p97_p8 = scmp.ne.s32.totalorder %s60_s1, %s96_s26  ;;  %p101_p9 = scmp.lt.s32.totalorder %s60_s1, %s60_s1 }
  0x19   :  { %v32_v7 = vsub.f32 %v30_v4, %v31_v5  ;;  %vm40_vm0 = vcmp.lt.s32.totalorder %v27_v6, 2  ;;  %p102_p10 = scmp.lt.s32.totalorder %s100_s27, %s96_s26 }
  0x1b   :  { %p103_p11 = por %p102_p10, %p101_p9 }
  0x1d   :  { %p104_p12 = pnand %p103_p11, %p97_p8 }
  0x22   :  { %v73_v8 = vpop.eup %72 }
  0x23   :  { %v35_v9 = vsub.f32 %v32_v7, %v73_v8 }
  0x25   :  { %v41_v10 = vsel %vm40_vm0, %v35_v9, 0.0 }
  0x26   :  { %v43_v11 = vsel %vm42_vm1, %v41_v10, 0.0 }
  0x27   :  { %v44_v12 = vrot.slane %v43_v11, 4 }
  0x29   :  { %v45_v13 = vadd.f32 %v44_v12, %v43_v11 }
  0x2b   :  { %v46_v14 = vrot.slane %v45_v13, 2 }
  0x2d   :  { %v47_v15 = vadd.f32 %v46_v14, %v45_v13 }
  0x2f   :  { %v48_v16 = vrot.slane %v47_v15, 1 }
  0x31   :  { %v49_v17 = vadd.f32 %v48_v16, %v47_v15 }
  0x33   :  { %52 = vst.msk [vmem:[#allocation5] sm:$0x1] %vm51_vm2, %v49_v17 }
  0x34   :  { %107 = shalt.err (!%p104_p12)
}
  0x35   :  { %s108_s30 = scalar_lea.hbm %s170_s2, 16 }
  0x36   :  { %p109_p13 = scmp.ne.s32.totalorder %s170_s2, %s108_s30  ;;  %p112_p0 = scmp.lt.u32.totalorder %s108_s30, %s170_s2 }
  0x38   :  { %p114_p1 = pnand %p112_p0, %p109_p13 }
  0x3a   :  { %117 = shalt.err (!%p114_p1)
}
  0x3b   :  { %62 = dma.vmem_to_hbm [thread:$0]  %s60_s1, 16, %s170_s2, [#allocation4]  }
  0x3c   :  { %120 = dma.done.wait [#allocation4], 16  }
  0x3d   :  { %121 = vsyncadd [#allocation4], 4294967280 }
  0x3e   :  { %66 = vsyncpa [#allocation3], 1 }
  0x3f   :  { %67 = vsyncpa [#allocation4], 1 }

</bundles_post_ra>
